<compile_context>
chip_gen: v7x
topology: tpu7x:2x2x1
jax: 0.10.0
libtpu: 0.0.40
codegen_flags: <defaults>
</compile_context>

<pallas_src>
import jax
import jax.numpy as jnp
from jax.experimental import pallas as pl
from jax.experimental.pallas import tpu as pltpu

EPS = 1e-6


def _gelu_tanh(x):
    # GELU(approximate='tanh'), f32 math
    c = 0.7978845608028654  # sqrt(2/pi)
    return 0.5 * x * (1.0 + jnp.tanh(c * (x + 0.044715 * x * x * x)))


def _silu(x):
    return x * jax.nn.sigmoid(x)


def _round_up(x, m):
    return ((x + m - 1) // m) * m


# --------------------------------------------------------------------------
# Host-side one-time repack of the module parameters into two packed slabs.
# --------------------------------------------------------------------------
def prepare_fused_params(p):
    f32, bf16 = jnp.float32, jnp.bfloat16
    A, H = p["emb"].shape
    S1 = p["w1"].shape[0]
    S2 = p["w2"].shape[0]
    H4 = 4 * H

    K1 = S1 + A + S2 + 1                    # fused-fc LHS width (incl. ones lane)
    K1P = _round_up(K1, 8)                  # padded to 8 lanes
    r_fc = 0
    r_mod = _round_up(r_fc + K1P, 16)       # row starts multiple of 16 (bf16 tiles)
    r_h1 = _round_up(r_mod + H, 16)
    r_h2 = _round_up(r_h1 + H, 16)
    R = _round_up(r_h2 + 2 * H4, 16)
    C = max(2 * H, 2 * H4, A + 1, 128)

    # block-diagonal fc1 / (embedding ; fc2), biases folded via the ones lane
    w_fc = jnp.zeros((K1P, 2 * H), f32)
    w_fc = w_fc.at[0:S1, 0:H].set(p["w1"])
    w_fc = w_fc.at[S1:S1 + A, H:].set(p["emb"])
    w_fc = w_fc.at[S1 + A:S1 + A + S2, H:].set(p["w2"])
    w_fc = w_fc.at[K1 - 1, 0:H].set(p["b1"][0])
    w_fc = w_fc.at[K1 - 1, H:].set(p["b2"][0])

    # fused advantage/value hidden layer and block-diagonal output heads
    w_h1 = jnp.concatenate([p["wa1"], p["wv1"]], axis=1)           # (H, 8H)
    b_h1 = jnp.concatenate([p["ba1"], p["bv1"]], axis=1)           # (1, 8H)
    w_h2 = jnp.zeros((2 * H4, A + 1), f32)
    w_h2 = w_h2.at[:H4, :A].set(p["wa2"])
    w_h2 = w_h2.at[H4:, A:].set(p["wv2"])
    b_h2 = jnp.concatenate([p["ba2"], p["bv2"]], axis=1)           # (1, A+1)

    # one contiguous bf16 weight slab (single DMA, VMEM-resident across grid)
    w_slab = jnp.zeros((R, C), f32)
    w_slab = w_slab.at[r_fc:r_fc + K1P, 0:2 * H].set(w_fc)
    w_slab = w_slab.at[r_mod:r_mod + H, 0:2 * H].set(p["wmod"])
    w_slab = w_slab.at[r_h1:r_h1 + H, 0:2 * H4].set(w_h1)
    w_slab = w_slab.at[r_h2:r_h2 + 2 * H4, 0:A + 1].set(w_h2)
    w_slab = w_slab.astype(bf16)

    # one f32 bias slab (rows: adaLN shift|1+scale, h1, h2)
    b_slab = jnp.zeros((8, C), f32)
    b_slab = b_slab.at[0, 0:H].set(p["bmod"][0, :H])
    b_slab = b_slab.at[0, H:2 * H].set(p["bmod"][0, H:] + 1.0)     # fold the "+1"
    b_slab = b_slab.at[1, 0:2 * H4].set(b_h1[0])
    b_slab = b_slab.at[2, 0:A + 1].set(b_h2[0])

    layout = dict(K1=K1, K1P=K1P, r_fc=r_fc, r_mod=r_mod, r_h1=r_h1,
                  r_h2=r_h2, R=R, C=C)
    return dict(A=A, H=H, S1=S1, S2=S2, w_slab=w_slab, b_slab=b_slab,
                layout=layout)


# --------------------------------------------------------------------------
# Kernel
# --------------------------------------------------------------------------
def _make_kernel(B, S1, S2, A, H, layout):
    K1P = layout["K1P"]
    r_mod, r_h1, r_h2 = layout["r_mod"], layout["r_h1"], layout["r_h2"]
    H2, H8 = 2 * H, 8 * H
    inv_ba = 1.0 / (B * A)
    f32, bf16 = jnp.float32, jnp.bfloat16

    def kernel(prev_ref, ss_ref, ts_ref, w_ref, b_ref, out_ref, lhs_scr):
        # -- assemble fused-fc LHS: [single_state | onehot(prev) | trend | 1 | 0]
        #    (every lane is fully overwritten each step -> safe under "parallel")
        lhs_scr[:, 0:S1] = ss_ref[...]
        lane = jax.lax.broadcasted_iota(jnp.int32, (B, A), 1)
        # one-hot over exactly A lanes: out-of-range actions -> zero embedding
        lhs_scr[:, S1:S1 + A] = (lane == prev_ref[...]).astype(f32)
        lhs_scr[:, S1 + A:S1 + A + S2] = ts_ref[...]
        tail_w = K1P - (S1 + A + S2)
        tail = (jax.lax.broadcasted_iota(jnp.int32, (B, tail_w), 1) == 0)
        lhs_scr[:, S1 + A + S2:K1P] = tail.astype(f32)      # [1, 0, 0, ...]

        lhs = lhs_scr[...].astype(bf16)

        # push 1: block-diag [fc1 | emb ; fc2]  (biases folded via ones lane)
        fc_out = jnp.dot(lhs, w_ref[0:K1P, 0:H2],
                         preferred_element_type=f32)                 # (B, 2H)
        ss_hidden = fc_out[:, 0:H]
        c = fc_out[:, H:H2]

        # push 2: fused adaLN -> [shift | 1+scale]  (SiLU in f32)
        s = _silu(c).astype(bf16)
        mod = jnp.dot(s, w_ref[r_mod:r_mod + H, 0:H2],
                      preferred_element_type=f32) + b_ref[0:1, 0:H2]
        shift = mod[:, 0:H]
        scale1 = mod[:, H:H2]

        # LayerNorm (no affine, eps=1e-6) + modulate, all f32
        mean = jnp.mean(ss_hidden, axis=-1, keepdims=True)
        var = jnp.mean(jnp.square(ss_hidden - mean), axis=-1, keepdims=True)
        xn = (ss_hidden - mean) * jax.lax.rsqrt(var + EPS)
        x = (xn * scale1 + shift).astype(bf16)                        # (B, H)

        # push 3: fused advantage/value hidden layer + GELU(tanh) in f32
        # TODO(synk): on v6e/v7x this GELU could run in bf16 (bf16 VPU/EUP);
        # kept f32 so the same kernel is correct/fast on v5e too.
        h = _gelu_tanh(jnp.dot(x, w_ref[r_h1:r_h1 + H, 0:H8],
                               preferred_element_type=f32) + b_ref[1:2, 0:H8])

        # push 4: block-diag output heads -> [advantage | value]
        slab = jnp.dot(h.astype(bf16), w_ref[r_h2:r_h2 + H8, 0:A + 1],
                       preferred_element_type=f32) + b_ref[2:3, 0:A + 1]
        adv = slab[:, 0:A]
        val = slab[:, A:A + 1]
        out_ref[...] = val + adv - jnp.sum(adv) * inv_ba

    return kernel


# --------------------------------------------------------------------------
# Wrapper
# --------------------------------------------------------------------------
def subagent_forward(single_state, trend_state, previous_action, fused):
    """Forward pass.

    Accepts either a single call's batch (B, S1)/(B, S2)/(B,) or a stack of T
    independent calls (T, B, S1)/(T, B, S2)/(T, B).  Each grid step is one
    independent forward call (its own advantage.mean()), so weights stay
    VMEM-resident across steps and launch cost is amortized over T.
    """
    single = single_state.ndim == 2
    if single:
        single_state = single_state[None]
        trend_state = trend_state[None]
        previous_action = previous_action[None]

    T, B, S1 = single_state.shape
    S2 = trend_state.shape[-1]
    A, H = fused["A"], fused["H"]
    L = fused["layout"]

    prev = previous_action.astype(jnp.int32).reshape(T, B, 1)
    kernel = _make_kernel(B, S1, S2, A, H, L)

    step_idx = lambda t: (t, 0, 0)
    const_idx = lambda t: (0, 0)

    out = pl.pallas_call(
        kernel,
        out_shape=jax.ShapeDtypeStruct((T, B, A), jnp.float32),
        grid_spec=pltpu.PrefetchScalarGridSpec(
            num_scalar_prefetch=0,
            grid=(T,),
            in_specs=[
                pl.BlockSpec((None, B, 1), step_idx),        # previous_action
                pl.BlockSpec((None, B, S1), step_idx),       # single_state
                pl.BlockSpec((None, B, S2), step_idx),       # trend_state
                pl.BlockSpec((L["R"], L["C"]), const_idx),   # weight slab (resident)
                pl.BlockSpec((8, L["C"]), const_idx),        # bias slab (resident)
            ],
            out_specs=pl.BlockSpec((None, B, A), step_idx),
            scratch_shapes=[pltpu.VMEM((B, L["K1P"]), jnp.float32)],
        ),
        compiler_params=pltpu.CompilerParams(
            # step axis is embarrassingly parallel -> both v7x TensorCores
            dimension_semantics=("parallel",)),
    )(prev, single_state, trend_state, fused["w_slab"], fused["b_slab"])

    return out[0] if single else out


# --------------------------------------------------------------------------
# Parameter init + references
# --------------------------------------------------------------------------
def init_params(key, state_dim_1, state_dim_2, action_dim, hidden_dim):
    ks = jax.random.split(key, 8)
    H = hidden_dim

    def lin(k, fan_in, fan_out):
        bound = 1.0 / jnp.sqrt(fan_in)
        kw, kb = jax.random.split(k)
        w = jax.random.uniform(kw, (fan_in, fan_out), jnp.float32, -bound, bound)
        b = jax.random.uniform(kb, (1, fan_out), jnp.float32, -bound, bound)
        return w, b

    emb = jax.random.normal(ks[0], (action_dim, H), jnp.float32)
    w1, b1 = lin(ks[1], state_dim_1, H)
    w2, b2 = lin(ks[2], state_dim_2, H)
    wmod, bmod = lin(ks[3], H, 2 * H)
    wa1, ba1 = lin(ks[4], H, 4 * H)
    wa2, ba2 = lin(ks[5], 4 * H, action_dim)
    wv1, bv1 = lin(ks[6], H, 4 * H)
    wv2, bv2 = lin(ks[7], 4 * H, 1)
    return dict(emb=emb, w1=w1, b1=b1, w2=w2, b2=b2, wmod=wmod, bmod=bmod,
                wa1=wa1, ba1=ba1, wa2=wa2, ba2=ba2, wv1=wv1, bv1=bv1,
                wv2=wv2, bv2=bv2)


def reference_forward_f32(single_state, trend_state, previous_action, p):
    """Pure-JAX f32 reference mirroring the PyTorch forward exactly (one call)."""
    H = p["emb"].shape[1]
    action_hidden = p["emb"][previous_action]
    ss = single_state @ p["w1"] + p["b1"]
    ts = trend_state @ p["w2"] + p["b2"]
    c = action_hidden + ts
    mod = _silu(c) @ p["wmod"] + p["bmod"]
    shift, scale = mod[:, :H], mod[:, H:]
    mean = ss.mean(-1, keepdims=True)
    var = ((ss - mean) ** 2).mean(-1, keepdims=True)
    xn = (ss - mean) / jnp.sqrt(var + EPS)
    x = xn * (1 + scale) + shift
    adv = _gelu_tanh(x @ p["wa1"] + p["ba1"]) @ p["wa2"] + p["ba2"]
    val = _gelu_tanh(x @ p["wv1"] + p["bv1"]) @ p["wv2"] + p["bv2"]
    return val + adv - adv.mean()


def reference_forward_fused(single_state, trend_state, previous_action, fused):
    """Plain-JAX replica of the kernel's packed-slab bf16 math (tight check)."""
    f32, bf16 = jnp.float32, jnp.bfloat16
    A, H = fused["A"], fused["H"]
    L = fused["layout"]
    B, S1 = single_state.shape
    S2 = trend_state.shape[-1]
    w, b = fused["w_slab"], fused["b_slab"]

    onehot = jax.nn.one_hot(previous_action, A, dtype=f32)
    ones = jnp.ones((B, 1), f32)
    pad = jnp.zeros((B, L["K1P"] - (S1 + A + S2 + 1)), f32)
    lhs = jnp.concatenate([single_state, onehot, trend_state, ones, pad],
                          axis=1).astype(bf16)

    fc_out = jnp.dot(lhs, w[0:L["K1P"], 0:2 * H], preferred_element_type=f32)
    ss, c = fc_out[:, :H], fc_out[:, H:]
    s = _silu(c).astype(bf16)
    mod = jnp.dot(s, w[L["r_mod"]:L["r_mod"] + H, 0:2 * H],
                  preferred_element_type=f32) + b[0:1, 0:2 * H]
    shift, scale1 = mod[:, :H], mod[:, H:]
    mean = ss.mean(-1, keepdims=True)
    var = ((ss - mean) ** 2).mean(-1, keepdims=True)
    xn = (ss - mean) * jax.lax.rsqrt(var + EPS)
    x = (xn * scale1 + shift).astype(bf16)
    h = _gelu_tanh(jnp.dot(x, w[L["r_h1"]:L["r_h1"] + H, 0:8 * H],
                           preferred_element_type=f32) + b[1:2, 0:8 * H])
    slab = jnp.dot(h.astype(bf16), w[L["r_h2"]:L["r_h2"] + 8 * H, 0:A + 1],
                   preferred_element_type=f32) + b[2:3, 0:A + 1]
    adv, val = slab[:, :A], slab[:, A:A + 1]
    return val + adv - adv.mean()


# --------------------------------------------------------------------------
if __name__ == "__main__":
    # Small shapes consistent with the module's forward; T independent calls.
    T, B, S1, S2, A, H = 4, 8, 32, 16, 4, 32

    key = jax.random.PRNGKey(0)
    k_params, k_ss, k_ts, k_act = jax.random.split(key, 4)

    params = init_params(k_params, S1, S2, A, H)
    fused = prepare_fused_params(params)

    single_state = jax.random.normal(k_ss, (T, B, S1), jnp.float32)
    trend_state = jax.random.normal(k_ts, (T, B, S2), jnp.float32)
    previous_action = jax.random.randint(k_act, (T, B), 0, A, jnp.int32)

    out = subagent_forward(single_state, trend_state, previous_action, fused)
    out = jax.block_until_ready(out)
    assert out.shape == (T, B, A)

    # Tight check: same bf16-operand / f32-accumulate math as the kernel.
    ref_fused = jax.vmap(
        lambda s, t, a: reference_forward_fused(s, t, a, fused)
    )(single_state, trend_state, previous_action)
    assert jnp.allclose(out, ref_fused, atol=5e-3, rtol=5e-3), \
        "mismatch vs fused bf16 reference"

    # Loose sanity check vs the exact f32 PyTorch-equivalent forward
    # (difference is only bf16 quantization of matmul operands / folded biases).
    ref_f32 = jax.vmap(
        lambda s, t, a: reference_forward_f32(s, t, a, params)
    )(single_state, trend_state, previous_action)
    assert jnp.allclose(out, ref_f32, atol=2.5e-1, rtol=5e-2), \
        "mismatch vs f32 reference"

    # Single-call (2-D input) path must agree with the corresponding grid step.
    out0 = subagent_forward(single_state[0], trend_state[0],
                            previous_action[0], fused)
    out0 = jax.block_until_ready(out0)
    assert out0.shape == (B, A)
    assert jnp.allclose(out0, out[0], atol=1e-5, rtol=1e-5)

    print("KERNEL_OK")
</pallas_src>

<mosaic_0001>
module attributes {stable_mosaic.version = 11 : i64} {
  func.func @kernel(%arg0: i32, %arg1: memref<1x8x1xi32, #tpu.memory_space<vmem>>, %arg2: memref<1x8x32xf32, #tpu.memory_space<vmem>>, %arg3: memref<1x8x16xf32, #tpu.memory_space<vmem>>, %arg4: memref<384x256xbf16, #tpu.memory_space<vmem>>, %arg5: memref<8x256xf32, #tpu.memory_space<vmem>>, %arg6: memref<1x8x4xf32, #tpu.memory_space<vmem>>, %arg7: memref<8x56xf32, #tpu.memory_space<vmem>>) attributes {dimension_semantics = [#tpu.dimension_semantics<parallel>], iteration_bounds = array<i64: 4>, scalar_prefetch = 0 : i64, scratch_operands = 1 : i64, tpu.core_type = #tpu.core_type<tc>, window_params = [{transform_indices = @transform_0, window_bounds = array<i64: 1, 8, 1>}, {transform_indices = @transform_1, window_bounds = array<i64: 1, 8, 32>}, {transform_indices = @transform_2, window_bounds = array<i64: 1, 8, 16>}, {pipeline_mode = #tpu.pipeline_mode<synchronous>, transform_indices = @transform_3, window_bounds = array<i64: 384, 256>}, {pipeline_mode = #tpu.pipeline_mode<synchronous>, transform_indices = @transform_4, window_bounds = array<i64: 8, 256>}, {transform_indices = @transform_5, window_bounds = array<i64: 1, 8, 4>}]} {
    %c0 = arith.constant 0 : index
    %c0_0 = arith.constant 0 : index
    %c0_1 = arith.constant 0 : index
    %0 = vector.load %arg2[%c0, %c0_0, %c0_1] : memref<1x8x32xf32, #tpu.memory_space<vmem>>, vector<1x8x32xf32>
    %1 = vector.shape_cast %0 : vector<1x8x32xf32> to vector<8x32xf32>
    %c0_2 = arith.constant 0 : index
    %c0_3 = arith.constant 0 : index
    %2 = vector.load %arg7[%c0_2, %c0_3] : memref<8x56xf32, #tpu.memory_space<vmem>>, vector<8x32xf32>
    tpu.vector_store %arg7[%c0_2, %c0_3], %1 {strides = array<i32>} : memref<8x56xf32, #tpu.memory_space<vmem>>, vector<8x32xf32>,
    %3 = tpu.iota {dimensions = array<i32: 1>} : vector<8x4xi32>
    %c0_4 = arith.constant 0 : index
    %c0_5 = arith.constant 0 : index
    %c0_6 = arith.constant 0 : index
    %4 = vector.load %arg1[%c0_4, %c0_5, %c0_6] : memref<1x8x1xi32, #tpu.memory_space<vmem>>, vector<1x8x1xi32>
    %5 = vector.shape_cast %4 : vector<1x8x1xi32> to vector<8x1xi32>
    %6 = vector.broadcast %5 : vector<8x1xi32> to vector<8x4xi32>
    %7 = arith.cmpi eq, %3, %6 : vector<8x4xi32>
    %8 = arith.extui %7 : vector<8x4xi1> to vector<8x4xi32>
    %9 = arith.sitofp %8 : vector<8x4xi32> to vector<8x4xf32>
    %c0_7 = arith.constant 0 : index
    %c32 = arith.constant 32 : index
    %10 = vector.load %arg7[%c0_7, %c32] : memref<8x56xf32, #tpu.memory_space<vmem>>, vector<8x4xf32>
    tpu.vector_store %arg7[%c0_7, %c32], %9 {strides = array<i32>} : memref<8x56xf32, #tpu.memory_space<vmem>>, vector<8x4xf32>,
    %c0_8 = arith.constant 0 : index
    %c0_9 = arith.constant 0 : index
    %c0_10 = arith.constant 0 : index
    %11 = vector.load %arg3[%c0_8, %c0_9, %c0_10] : memref<1x8x16xf32, #tpu.memory_space<vmem>>, vector<1x8x16xf32>
    %12 = vector.shape_cast %11 : vector<1x8x16xf32> to vector<8x16xf32>
    %c0_11 = arith.constant 0 : index
    %c36 = arith.constant 36 : index
    %13 = vector.load %arg7[%c0_11, %c36] : memref<8x56xf32, #tpu.memory_space<vmem>>, vector<8x16xf32>
    tpu.vector_store %arg7[%c0_11, %c36], %12 {strides = array<i32>} : memref<8x56xf32, #tpu.memory_space<vmem>>, vector<8x16xf32>,
    %14 = tpu.iota {dimensions = array<i32: 1>} : vector<8x4xi32>
    %c0_i32 = arith.constant 0 : i32
    %15 = vector.broadcast %c0_i32 : i32 to vector<8x4xi32>
    %16 = arith.cmpi eq, %14, %15 : vector<8x4xi32>
    %17 = arith.extui %16 : vector<8x4xi1> to vector<8x4xi32>
    %18 = arith.sitofp %17 : vector<8x4xi32> to vector<8x4xf32>
    %c0_12 = arith.constant 0 : index
    %c52 = arith.constant 52 : index
    %19 = vector.load %arg7[%c0_12, %c52] : memref<8x56xf32, #tpu.memory_space<vmem>>, vector<8x4xf32>
    tpu.vector_store %arg7[%c0_12, %c52], %18 {strides = array<i32>} : memref<8x56xf32, #tpu.memory_space<vmem>>, vector<8x4xf32>,
    %c0_13 = arith.constant 0 : index
    %c0_14 = arith.constant 0 : index
    %20 = vector.load %arg7[%c0_13, %c0_14] : memref<8x56xf32, #tpu.memory_space<vmem>>, vector<8x56xf32>
    %21 = arith.truncf %20 : vector<8x56xf32> to vector<8x56xbf16>
    %c0_15 = arith.constant 0 : index
    %c0_16 = arith.constant 0 : index
    %22 = vector.load %arg4[%c0_15, %c0_16] : memref<384x256xbf16, #tpu.memory_space<vmem>>, vector<56x64xbf16>
    %cst = arith.constant dense<0.000000e+00> : vector<8x64xf32>
    %23 = tpu.matmul %21, %22, %cst {dimension_numbers = #tpu.dot_dimension_numbers<[1], [0], [0], [1], [0, 0, 1, 1], [], []>} : vector<8x56xbf16>, vector<56x64xbf16>, vector<8x64xf32> -> vector<8x64xf32>
    %24 = vector.extract_strided_slice %23 {offsets = [0, 0], sizes = [8, 32], strides = [1, 1]} : vector<8x64xf32> to vector<8x32xf32>
    %25 = vector.extract_strided_slice %23 {offsets = [0, 32], sizes = [8, 32], strides = [1, 1]} : vector<8x64xf32> to vector<8x32xf32>
    %26 = arith.negf %25 : vector<8x32xf32>
    %27 = math.exp %26 : vector<8x32xf32>
    %cst_17 = arith.constant 1.000000e+00 : f32
    %28 = vector.broadcast %cst_17 : f32 to vector<8x32xf32>
    %29 = arith.addf %28, %27 : vector<8x32xf32>
    %30 = arith.divf %28, %29 : vector<8x32xf32>
    %31 = arith.mulf %25, %30 : vector<8x32xf32>
    %32 = arith.truncf %31 : vector<8x32xf32> to vector<8x32xbf16>
    %c64 = arith.constant 64 : index
    %c0_18 = arith.constant 0 : index
    %33 = vector.load %arg4[%c64, %c0_18] : memref<384x256xbf16, #tpu.memory_space<vmem>>, vector<32x64xbf16>
    %cst_19 = arith.constant dense<0.000000e+00> : vector<8x64xf32>
    %34 = tpu.matmul %32, %33, %cst_19 {dimension_numbers = #tpu.dot_dimension_numbers<[1], [0], [0], [1], [0, 0, 1, 1], [], []>} : vector<8x32xbf16>, vector<32x64xbf16>, vector<8x64xf32> -> vector<8x64xf32>
    %c0_20 = arith.constant 0 : index
    %c0_21 = arith.constant 0 : index
    %35 = vector.load %arg5[%c0_20, %c0_21] : memref<8x256xf32, #tpu.memory_space<vmem>>, vector<1x64xf32>
    %36 = vector.broadcast %35 : vector<1x64xf32> to vector<8x64xf32>
    %37 = arith.addf %34, %36 : vector<8x64xf32>
    %38 = vector.extract_strided_slice %37 {offsets = [0, 0], sizes = [8, 32], strides = [1, 1]} : vector<8x64xf32> to vector<8x32xf32>
    %39 = vector.extract_strided_slice %37 {offsets = [0, 32], sizes = [8, 32], strides = [1, 1]} : vector<8x64xf32> to vector<8x32xf32>
    %cst_22 = arith.constant dense<0.000000e+00> : vector<8xf32>
    %40 = vector.multi_reduction <add>, %24, %cst_22 [1] : vector<8x32xf32> to vector<8xf32>
    %41 = vector.shape_cast %40 : vector<8xf32> to vector<8x1xf32>
    %cst_23 = arith.constant 3.200000e+01 : f32
    %42 = vector.broadcast %cst_23 : f32 to vector<8x1xf32>
    %43 = arith.divf %41, %42 : vector<8x1xf32>
    %44 = vector.broadcast %43 : vector<8x1xf32> to vector<8x32xf32>
    %45 = arith.subf %24, %44 : vector<8x32xf32>
    %46 = arith.mulf %45, %45 : vector<8x32xf32>
    %cst_24 = arith.constant dense<0.000000e+00> : vector<8xf32>
    %47 = vector.multi_reduction <add>, %46, %cst_24 [1] : vector<8x32xf32> to vector<8xf32>
    %48 = vector.shape_cast %47 : vector<8xf32> to vector<8x1xf32>
    %cst_25 = arith.constant 3.200000e+01 : f32
    %49 = vector.broadcast %cst_25 : f32 to vector<8x1xf32>
    %50 = arith.divf %48, %49 : vector<8x1xf32>
    %51 = vector.broadcast %43 : vector<8x1xf32> to vector<8x32xf32>
    %52 = arith.subf %24, %51 : vector<8x32xf32>
    %cst_26 = arith.constant 9.99999997E-7 : f32
    %53 = vector.broadcast %cst_26 : f32 to vector<8x1xf32>
    %54 = arith.addf %50, %53 : vector<8x1xf32>
    %55 = math.rsqrt %54 : vector<8x1xf32>
    %56 = vector.broadcast %55 : vector<8x1xf32> to vector<8x32xf32>
    %57 = arith.mulf %52, %56 : vector<8x32xf32>
    %58 = arith.mulf %57, %39 : vector<8x32xf32>
    %59 = arith.addf %58, %38 : vector<8x32xf32>
    %60 = arith.truncf %59 : vector<8x32xf32> to vector<8x32xbf16>
    %c96 = arith.constant 96 : index
    %c0_27 = arith.constant 0 : index
    %61 = vector.load %arg4[%c96, %c0_27] : memref<384x256xbf16, #tpu.memory_space<vmem>>, vector<32x256xbf16>
    %cst_28 = arith.constant dense<0.000000e+00> : vector<8x256xf32>
    %62 = tpu.matmul %60, %61, %cst_28 {dimension_numbers = #tpu.dot_dimension_numbers<[1], [0], [0], [1], [0, 0, 1, 1], [], []>} : vector<8x32xbf16>, vector<32x256xbf16>, vector<8x256xf32> -> vector<8x256xf32>
    %c1 = arith.constant 1 : index
    %c0_29 = arith.constant 0 : index
    %63 = vector.load %arg5[%c1, %c0_29] : memref<8x256xf32, #tpu.memory_space<vmem>>, vector<1x256xf32>
    %64 = vector.broadcast %63 : vector<1x256xf32> to vector<8x256xf32>
    %65 = arith.addf %62, %64 : vector<8x256xf32>
    %cst_30 = arith.constant 5.000000e-01 : f32
    %66 = vector.broadcast %cst_30 : f32 to vector<8x256xf32>
    %67 = arith.mulf %66, %65 : vector<8x256xf32>
    %cst_31 = arith.constant 4.471500e-02 : f32
    %68 = vector.broadcast %cst_31 : f32 to vector<8x256xf32>
    %69 = arith.mulf %68, %65 : vector<8x256xf32>
    %70 = arith.mulf %69, %65 : vector<8x256xf32>
    %71 = arith.mulf %70, %65 : vector<8x256xf32>
    %72 = arith.addf %65, %71 : vector<8x256xf32>
    %cst_32 = arith.constant 0.797884583 : f32
    %73 = vector.broadcast %cst_32 : f32 to vector<8x256xf32>
    %74 = arith.mulf %73, %72 : vector<8x256xf32>
    %75 = math.tanh %74 : vector<8x256xf32>
    %cst_33 = arith.constant 1.000000e+00 : f32
    %76 = vector.broadcast %cst_33 : f32 to vector<8x256xf32>
    %77 = arith.addf %76, %75 : vector<8x256xf32>
    %78 = arith.mulf %67, %77 : vector<8x256xf32>
    %79 = arith.truncf %78 : vector<8x256xf32> to vector<8x256xbf16>
    %c128 = arith.constant 128 : index
    %c0_34 = arith.constant 0 : index
    %80 = vector.load %arg4[%c128, %c0_34] : memref<384x256xbf16, #tpu.memory_space<vmem>>, vector<256x5xbf16>
    %cst_35 = arith.constant dense<0.000000e+00> : vector<8x5xf32>
    %81 = tpu.matmul %79, %80, %cst_35 {dimension_numbers = #tpu.dot_dimension_numbers<[1], [0], [0], [1], [0, 0, 1, 1], [], []>} : vector<8x256xbf16>, vector<256x5xbf16>, vector<8x5xf32> -> vector<8x5xf32>
    %c2 = arith.constant 2 : index
    %c0_36 = arith.constant 0 : index
    %82 = vector.load %arg5[%c2, %c0_36] : memref<8x256xf32, #tpu.memory_space<vmem>>, vector<1x5xf32>
    %83 = vector.broadcast %82 : vector<1x5xf32> to vector<8x5xf32>
    %84 = arith.addf %81, %83 : vector<8x5xf32>
    %85 = vector.extract_strided_slice %84 {offsets = [0, 0], sizes = [8, 4], strides = [1, 1]} : vector<8x5xf32> to vector<8x4xf32>
    %86 = vector.extract_strided_slice %84 {offsets = [0, 4], sizes = [8, 1], strides = [1, 1]} : vector<8x5xf32> to vector<8x1xf32>
    %87 = vector.broadcast %86 : vector<8x1xf32> to vector<8x4xf32>
    %88 = arith.addf %87, %85 : vector<8x4xf32>
    %89 = vector.shape_cast %85 : vector<8x4xf32> to vector<1x8x4xf32>
    %cst_37 = arith.constant dense<0.000000e+00> : vector<1xf32>
    %90 = vector.multi_reduction <add>, %89, %cst_37 [1, 2] : vector<1x8x4xf32> to vector<1xf32>
    %91 = vector.shape_cast %90 : vector<1xf32> to vector<1x1x1xf32>
    %92 = vector.extract %91[0, 0, 0] : f32 from vector<1x1x1xf32>
    %cst_38 = arith.constant 3.125000e-02 : f32
    %93 = arith.mulf %92, %cst_38 : f32
    %94 = vector.broadcast %93 : f32 to vector<8x4xf32>
    %95 = arith.subf %88, %94 : vector<8x4xf32>
    %c0_39 = arith.constant 0 : index
    %c0_40 = arith.constant 0 : index
    %c0_41 = arith.constant 0 : index
    %96 = vector.load %arg6[%c0_39, %c0_40, %c0_41] : memref<1x8x4xf32, #tpu.memory_space<vmem>>, vector<1x8x4xf32>
    %97 = vector.shape_cast %96 : vector<1x8x4xf32> to vector<8x4xf32>
    %98 = vector.shape_cast %95 : vector<8x4xf32> to vector<1x8x4xf32>
    tpu.vector_store %arg6[%c0_39, %c0_40, %c0_41], %98 {strides = array<i32>} : memref<1x8x4xf32, #tpu.memory_space<vmem>>, vector<1x8x4xf32>,
    return
  }
  func.func @transform_0(%arg0: i32) -> (i32, i32, i32) {
    %c0_i32 = arith.constant 0 : i32
    %c0_i32_0 = arith.constant 0 : i32
    %c0_i32_1 = arith.constant 0 : i32
    return %arg0, %c0_i32, %c0_i32_0 : i32, i32, i32
  }
  func.func @transform_1(%arg0: i32) -> (i32, i32, i32) {
    %c0_i32 = arith.constant 0 : i32
    %c0_i32_0 = arith.constant 0 : i32
    %c0_i32_1 = arith.constant 0 : i32
    return %arg0, %c0_i32, %c0_i32_0 : i32, i32, i32
  }
  func.func @transform_2(%arg0: i32) -> (i32, i32, i32) {
    %c0_i32 = arith.constant 0 : i32
    %c0_i32_0 = arith.constant 0 : i32
    %c0_i32_1 = arith.constant 0 : i32
    return %arg0, %c0_i32, %c0_i32_0 : i32, i32, i32
  }
  func.func @transform_3(%arg0: i32) -> (i32, i32) {
    %c0_i32 = arith.constant 0 : i32
    %c0_i32_0 = arith.constant 0 : i32
    %c0_i32_1 = arith.constant 0 : i32
    return %c0_i32, %c0_i32_0 : i32, i32
  }
  func.func @transform_4(%arg0: i32) -> (i32, i32) {
    %c0_i32 = arith.constant 0 : i32
    %c0_i32_0 = arith.constant 0 : i32
    %c0_i32_1 = arith.constant 0 : i32
    return %c0_i32, %c0_i32_0 : i32, i32
  }
  func.func @transform_5(%arg0: i32) -> (i32, i32, i32) {
    %c0_i32 = arith.constant 0 : i32
    %c0_i32_0 = arith.constant 0 : i32
    %c0_i32_1 = arith.constant 0 : i32
    return %arg0, %c0_i32, %c0_i32_0 : i32, i32, i32
  }
}

</mosaic_0001>

<bundles_post_ra>
// kernel: tpu_custom_call.1
= control target key start
LH: loop header
LB: loop body
LE: loop exit
PB: predicated region body
PF: predicated region fallthrough
CT: control target
= control target key end

     0   :  { %10 = vsyncpa [#allocation4], 0  ;;  %s1396_s0 = inlined_call_operand.vmem [shape: s32[4,8,1], index: 0, kind: input, shape index: {}]   ;;  %s1397_s1 = inlined_call_operand.vmem [shape: f32[4,8,32], index: 1, kind: input, shape index: {}]   ;;  %s1398_s2 = inlined_call_operand.hbm [shape: f32[4,8,16], index: 2, kind: input, shape index: {}]   ;;  %s1399_s3 = inlined_call_operand.hbm [shape: bf16[384,256], index: 3, kind: input, shape index: {}]   ;;  %s1400_s4 = inlined_call_operand.vmem [shape: f32[8,256], index: 4, kind: input, shape index: {}]   ;;  %s1401_s5 = inlined_call_operand.vmem [shape: f32[4,8,4], index: 5, kind: output, shape index: {}]  }
   0x1   :  { %12 = vsyncpa [#allocation4 + $0x1], 0 }
   0x2   :  { %13 = vsyncpa [#allocation6], 0  ;;  %s1224_s18 = smov 0   ;;  %s1226_s19 = smov 0  }
   0x3   :  { %s1228_s20 = smov 0   ;;  %s1230_s21 = smov 0  }
   0x4 LB: > { %s1243_s22 = sadd.s32 4294967295, %s1180_s21   ;;  %p91_p0 = scmp.ne.s32.totalorder %s1172_s19, %s1168_s18  ;;  %s1180_s21 = sphi %s1230_s21, %s1417_s21   ;;  %s1176_s20 = sphi %s1228_s20, %s1416_s20   ;;  %s1172_s19 = sphi %s1226_s19, %s1415_s19   ;;  %s1168_s18 = sphi %s1224_s18, %s1414_s18  }
   0x5   : > { %p1402_p1 = scmp.eq.s32.totalorder %s1243_s22, 0  ;;  %p885_p2 = scmp.ge.s32.totalorder %s1180_s21, 1 }
   0x6   : > { %p170_p3 = scmp.lt.s32.totalorder %s1180_s21, 5  ;;  %s1182_s25 = smov [#allocation5]  }
   0x7   : > { %p1251_p4 = por %p1402_p1, %p91_p0  ;;  %s182_s26 = sshll.u32 %s1182_s25, 4  ;;  %s183_s26 = int_to_ptr.vmem [resolvable:$true] %s182_s26 }
   0x8   : > { %p1255_p5 = pnand %p885_p2, %p170_p3  ;;  %s1268_s28 = sadd.s32 1, %s1180_s21  }
   0x9   : > { %s1405_s23 = scalar_select %p1251_p4, 1, 0 }
   0xa   : > { %s1406_s24 = scalar_select %p1255_p5, 1, 0 }
   0xb   : > { %p989_p6 = pneg %p1255_p5  ;;  %s78_s29 = sadd.s32 1, %s1176_s20 }
   0xc   : > { %s75_s30 = ssub.s32 %s1180_s21, %s1268_s28  ;;  %s1084_s8 = scalar_lea.hbm %s1399_s3, 6144 }
   0xd   : > { %p1263_p7 = pnand %p989_p6, %p1402_p1  ;;  %p1085_p8 = scmp.ne.s32.totalorder %s1399_s3, %s1084_s8 }
   0xe   : > { %p1091_p12 = scmp.lt.u32.totalorder %s1084_s8, %s1399_s3 }
   0xf   : > { %p1086_p9 = pneg %p1263_p7 }
  0x11   : > { %p1087_p10 = pnand %p1086_p9, %p1085_p8 }
  0x13   : > { %p1088_p11 = pneg %p1087_p10 }
  0x15   : > { %p1093_p13 = pnand %p1091_p12, %p1088_p11 }
  0x17   : > { %1096 = shalt.err (!%p1093_p13)
}
  0x18   : > { %s1097_s13 = scalar_lea.vmem %s183_s26, 6144  ;;  %p1105_p6 = scmp.lt.s32.totalorder %s183_s26, %s183_s26 }
  0x19   : > { %p1098_p0 = scmp.ne.s32.totalorder %s183_s26, %s1097_s13  ;;  %p1106_p1 = scmp.lt.s32.totalorder %s1097_s13, %s1097_s13 }
  0x1b   : > { %p1100_p2 = pnand %p1098_p0, %p1086_p9  ;;  %p1107_p4 = por %p1106_p1, %p1105_p6 }
  0x1d   : > { %p1101_p3 = pneg %p1100_p2 }
  0x1f   : > { %p1108_p5 = pnand %p1107_p4, %p1101_p3 }
  0x21   : > { %1111 = shalt.err (!%p1108_p5)
}
  0x22   : > { %s1183_s14 = smov 128   ;;  %s1184_s15 = smov 8  }
  0x23   : > { %992 = dma.hbm_to_vmem [thread:$0]  (!%p1263_p7), %s1399_s3, 6144, %s183_s26, [#allocation6], %s1183_s14, %s1183_s14, %s1184_s15  }
  0x24   : > { %p76_p8 = scmp.eq.s32.totalorder %s75_s30, 0  ;;  %p85_p9 = scmp.ne.s32.totalorder %s1176_s20, %s1172_s19 }
  0x25   : > { %p86_p1 = scmp.eq.s32.totalorder %s1180_s21, 0  ;;  %p998_p4 = scmp.lt.s32.totalorder %s1180_s21, 4 }
  0x26   : > { %s1294_s18 = scalar_select %p76_p8, %s1176_s20, %s78_s29  }
  0x27   : > { %p87_p5 = por %p86_p1, %p85_p9  ;;  %s213_s25 = sand.u32 1, %s1176_s20  }
  0x28   : > { %s888_s6 = sshll.u32 %s213_s25, 3  ;;  %s889_s7 = sshll.u32 %s1180_s21, 7 }
  0x29   : > { %s1301_s10 = scalar_lea.hbm %s1398_s2, %s889_s7  ;;  %s217_s26 = scalar_lea.vmem [#allocation3], %s888_s6 }
  0x2a   : > { %s224_s27 = sshll.u32 %s217_s26, 4  ;;  %p1305_p7 = pnand %p998_p4, %p87_p5  ;;  %s1303_s27 = int_to_ptr.vmem [resolvable:$true] %s224_s27 }
  0x2b   : > { %s214_s21 = scalar_lea.sflag [#allocation4], %s213_s25  ;;  %s1112_s30 = scalar_lea.hbm %s1301_s10, 128 }
  0x2c   : > { %p1113_p10 = scmp.ne.s32.totalorder %s1301_s10, %s1112_s30  ;;  %p1114_p11 = pneg %p1305_p7 }
  0x2d   : > { %s1117_s13 = scalar_lea.hbm %s1398_s2, 512  ;;  %p1118_p0 = scmp.lt.u32.totalorder %s1301_s10, %s1398_s2 }
  0x2e   : > { %p1115_p12 = pnand %p1114_p11, %p1113_p10  ;;  %p1119_p2 = scmp.lt.u32.totalorder %s1117_s13, %s1112_s30 }
  0x2f   : > { %p1121_p6 = scmp.lt.u32.totalorder %s1112_s30, %s1301_s10 }
  0x30   : > { %p1116_p13 = pneg %p1115_p12  ;;  %p1120_p3 = por %p1119_p2, %p1118_p0 }
  0x32   : > { %p1122_p8 = por %p1121_p6, %p1120_p3 }
  0x34   : > { %p1123_p9 = pnand %p1122_p8, %p1116_p13 }
  0x36   : > { %1126 = shalt.err (!%p1123_p9)
}
  0x37   : > { %s1127_s16 = scalar_lea.vmem %s1303_s27, 128  ;;  %s1185_s17 = smov [#allocation3]  }
  0x38   : > { %p1128_p1 = scmp.ne.s32.totalorder %s1303_s27, %s1127_s16  ;;  %s1132_s25 = sshll.u32 %s1185_s17, 4  ;;  %s1133_s25 = int_to_ptr.vmem [resolvable:$false] %s1132_s25 }
  0x39   : > { %s1134_s6 = scalar_lea.vmem %s1133_s25, 256  ;;  %p1135_p10 = scmp.lt.s32.totalorder %s1303_s27, %s1133_s25 }
  0x3a   : > { %p1130_p4 = pnand %p1128_p1, %p1114_p11  ;;  %p1136_p12 = scmp.lt.s32.totalorder %s1134_s6, %s1127_s16 }
  0x3c   : > { %p1131_p5 = pneg %p1130_p4  ;;  %p1137_p0 = por %p1136_p12, %p1135_p10 }
  0x3e   : > { %p1138_p2 = pnand %p1137_p0, %p1131_p5 }
  0x40   : > { %1141 = shalt.err (!%p1138_p2)
}
  0x41   : > { %996 = dma.hbm_to_vmem [thread:$0]  (!%p1305_p7), %s1301_s10, 128, %s1303_s27, %s214_s21  }
  0x42   : > { %p1409_p13 = scmp.ne.s32.totalorder %s1406_s24, 0 }
  0x43   : > { %s235_s7 = sand.u32 (!%p1409_p13), 1, %s1172_s19   ;;  %p1410_p11 = scmp.ne.s32.totalorder (!%p1409_p13), %s1405_s23, 0 }
  0x44   : > { %233 = sbr.rel (%p1409_p13) target bundleno = 1705 (0x6a9), region = 40  ;;  %s891_s8 = sshll.u32 (!%p1409_p13), %s235_s7, 3 }
  0x45   : > { %s236_s9 = scalar_lea.sflag (!%p1409_p13), [#allocation4], %s235_s7  ;;  %s239_s26 = scalar_lea.vmem (!%p1409_p13), [#allocation3], %s891_s8 }
  0x4b   : > { %1159 = dma.done.wait (%p1410_p11), %s236_s9, 128  }
  0x4c   : > { %1161 = vsyncadd (%p1410_p11), %s236_s9, 4294967168  ;;  %p1411_p3 = scmp.eq.s32.totalorder %s1243_s22, 0 }
  0x4e   : > { %1163 = dma.done.wait (%p1411_p3), [#allocation6], 6144   ;;  %p1412_p6 = pmov %p1411_p3 }
  0x4f   : > { %p277_p7 = scmp.lt.s32.totalorder %s1243_s22, 3  ;;  %v1186_v0 = vmov 0   ;;  %v1187_v1 = vmov 0.0   ;;  %v293_v2 = vlaneseq  ;;  %v308_v6 = vld [vmem:[%s239_s26] sm:$0xff]  ;;  %s1188_s11 = smov 36   ;;  %vm291_vm1 = vcmask 261120  }
  0x50   : > { %1165 = vsyncadd (%p1412_p6), [#allocation6], 4294961152  ;;  %1043 = vset.pattern.permute.xlu0 %v1186_v0  ;;  %961 = vmatprep.subr.bf16.mxu1 %v1187_v1  ;;  %v1046_v7 = vld [vmem:[#allocation5] ss:$8 sps:$4 sm:$0xff]   ;;  %v1047_v9 = vld [vmem:[#allocation5 + $0x10] ss:$8 sps:$4 sm:$0xff]  }
  0x51   : > { %s1419_s22 = smov (!%p277_p7, %s1243_s22), 3  ;;  %v294_v5 = vand.u32 127, %v293_v2  ;;  %310 = vrot.lane.b32.xlu1 %v308_v6, %s1188_s11  ;;  %962 = vmatpush3.bf16.msra.mxu1 %v1046_v7  ;;  %v1048_v10 = vld [vmem:[#allocation5 + $0x20] ss:$8 sps:$4 sm:$0xff]   ;;  %v1049_v11 = vld [vmem:[#allocation5 + $0x30] ss:$0 sps:$4 sm:$0xff]  }
  0x52   : > { %s1348_s24 = sshll.u32 %s1419_s22, 3  ;;  %s1189_s22 = smov 52   ;;  %963 = vmatprep.subr.bf16.mxu1 %v1187_v1  ;;  %vm358_vm2 = vcmask 1043456   ;;  %vm1190_vm3 = vmmov 0   ;;  %vm306_vm5 = vcmask 294144   ;;  %vm313_vm6 = vcmask 425248  }
  0x53   : > { %s280_s27 = scalar_lea.vmem %s1396_s0, %s1348_s24  ;;  %s284_s30 = scalar_lea.vmem %s1397_s1, %s1348_s24  ;;  %vm315_vm0 = vcmp.eq.s32.totalorder %v294_v5, 0  ;;  %969 = vmatprep.mubr.msk.bf16.mxu1 %vm1190_vm3, %v1187_v1  ;;  %v360_v12 = vsel %vm358_vm2, %v1049_v11, 0  ;;  %vm322_vm7 = vcmask 458144   ;;  %vm354_vm8 = vcmask 457728   ;;  %v1050_v20 = vld [vmem:[#allocation5 + $0x40] ss:$8 sps:$4 sm:$0xff]  }
  0x54   : > { %v295_v3 = vld [vmem:[%s280_s27] sm:$0xff]  ;;  %v897_v8 = vsel %vm315_vm0, 1.0, %v1187_v1  ;;  %s1191_s12 = smov 32   ;;  %s1192_s13 = smov 96   ;;  %v1052_v39 = vld [vmem:[#allocation5 + $0x60] ss:$8 sps:$4 sm:$0xff]  }
  0x55   : > { %v290_v4 = vld [vmem:[%s284_s30] sm:$0xff]  ;;  %297 = vperm.xlu0 %1043, %v295_v3   ;;  %319 = vrot.lane.b32.xlu1 %v897_v8, %s1189_s22  ;;  %v1054_v40 = vld [vmem:[#allocation5 + $0x64] ss:$8 sps:$4 sm:$0xff]   ;;  %v1058_v58 = vld [vmem:[#allocation5 + $0x100] ss:$8 sps:$4 sm:$0xff]   ;;  %v502_v11 = vshrl.u32 %v293_v2, 7  ;;  %s288_s23 = scalar_lea.vmem %s1401_s5, %s1348_s24 }
  0x56   : > { %292 = vst.msk [vmem:[#allocation2] sm:$0xff] %vm291_vm1, %v290_v4  ;;  %964 = vmatpush3.bf16.msra.mxu1 %v1047_v9  ;;  %v1051_v21 = vld [vmem:[#allocation5 + $0x50] ss:$8 sps:$4 sm:$0xff]   ;;  %v1057_v41 = vld [vmem:[#allocation5 + $0x74] ss:$8 sps:$4 sm:$0xff]   ;;  %939 = vmatprep.subr.bf16.mxu0 %v1058_v58  ;;  %vm770_vm9 = vcmask 31744  }
  0x57   : > { %965 = vmatprep.subr.bf16.mxu1 %v1187_v1  ;;  %v1055_v42 = vld [vmem:[#allocation5 + $0x70] ss:$8 sps:$4 sm:$0xff]   ;;  %v1059_v59 = vld [vmem:[#allocation5 + $0x80] ss:$8 sps:$4 sm:$0xff]  }
  0x58   : > { %v414_v43 = vld [vmem:[%s1400_s4] ss:$0 sm:$0xff]  ;;  %940 = vmatpush3.bf16.msra.mxu0 %v1059_v59  ;;  %v1062_v62 = vld [vmem:[#allocation5 + $0x120] ss:$8 sps:$4 sm:$0xff]  }
  0x59   : > { %v1060_v60 = vld [vmem:[#allocation5 + $0x110] ss:$8 sps:$4 sm:$0xff]   ;;  %v1063_v63 = vld [vmem:[#allocation5 + $0xa0] ss:$8 sps:$4 sm:$0xff]  }
  0x5a   : > { %966 = vmatpush3.bf16.msra.mxu1 %v1048_v10  ;;  %v1061_v61 = vld [vmem:[#allocation5 + $0x90] ss:$8 sps:$4 sm:$0xff]   ;;  %941 = vmatprep.subr.bf16.mxu0 %v1060_v60  ;;  %v1066_v3 = vld [vmem:[#allocation5 + $0x140] ss:$8 sps:$4 sm:$0xff]  }
  0x5b   : > { %967 = vmatprep.subr.bf16.mxu1 %v1187_v1  ;;  %v1067_v4 = vld [vmem:[#allocation5 + $0xc0] ss:$8 sps:$4 sm:$0xff]   ;;  %v1069_v6 = vld [vmem:[#allocation5 + $0xd0] ss:$8 sps:$4 sm:$0xff]  }
  0x5c   : > { %942 = vmatpush3.bf16.msra.mxu0 %v1061_v61  ;;  %v1070_v7 = vld [vmem:[#allocation5 + $0x160] ss:$8 sps:$4 sm:$0xff]   ;;  %v1072_v9 = vld [vmem:[#allocation5 + $0x170] ss:$8 sps:$4 sm:$0xff]  }
  0x5d   : > { %943 = vmatprep.subr.bf16.mxu0 %v1062_v62  ;;  %v1071_v8 = vld [vmem:[#allocation5 + $0xe0] ss:$8 sps:$4 sm:$0xff]   ;;  %v1073_v10 = vld [vmem:[#allocation5 + $0xf0] ss:$8 sps:$4 sm:$0xff]  }
  0x5e   : > { %968 = vmatpush3.bf16.msra.mxu1 %v360_v12  ;;  %v503_v12 = vsub.s32 0, %v502_v11 }
  0x5f   : > { %973 = vmatprep.subr.bf16.mxu1 %v1187_v1 }
  0x60   : > { %944 = vmatpush3.bf16.msra.mxu0 %v1063_v63 }
  0xc3   : > { %v311_v15 = vpop.permute.xlu1 %310 }
  0xc7   : > { %v320_v17 = vpop.permute.xlu1 %319 }
  0xd4   : > { %v298_v13 = vpop.permute.xlu0 %297 }
  0xd5   : > { %vm299_vm4 = vcmp.eq.s32.totalorder %v294_v5, %v298_v13  ;;  %v1068_v5 = vld [vmem:[#allocation5 + $0x150] ss:$8 sps:$4 sm:$0xff]  }
  0xd6   : > { %v896_v14 = vsel %vm299_vm4, 1.0, %v1187_v1  ;;  %v907_v13 = vld [vmem:[%s1400_s4 + $0x1] ss:$8 sm:$0x3] }
  0xd7   : > { %303 = vrot.lane.b32.xlu0 %v896_v14, %s1191_s12  ;;  %v507_v14 = vsub.s32 1, %v502_v11 }
 0x149   : > { %v304_v16 = vpop.permute.xlu0 %303 }
 0x14a   : > { %307 = vst.msk [vmem:[#allocation2] sm:$0xff] %vm306_vm5, %v304_v16  ;;  %v508_v16 = vrot.slane %v907_v13, %v507_v14 }
 0x14b   : > { %314 = vst.msk [vmem:[#allocation2] sm:$0xff] %vm313_vm6, %v311_v15  ;;  %v504_v15 = vrot.slane %v907_v13, %v503_v12 }
 0x14c   : > { %323 = vst.msk [vmem:[#allocation2] sm:$0xff] %vm322_vm7, %v320_v17 }
 0x153   : > { %v324_v18 = vld [vmem:[#allocation2] sm:$0xff] }
 0x154   : > { %v325_v19 = vpack.c.bf16 %v324_v18, %v324_v18 }
 0x156   : > { %970 = vmatmul.mubr.msk.bf16.vlgmr.msra.gmra.mrb[0].mxu1 %vm354_vm8, %v325_v19 }
 0x157   : > { %977 = vmatprep.mubr.msk.bf16.mxu1 %vm1190_vm3, %v1187_v1  ;;  %974 = vmatpush3.bf16.msra.mxu1 %v1050_v20 }
 0x158   : > { %975 = vmatprep.subr.bf16.mxu1 %v1187_v1  ;;  %v1065_v1 = vld [vmem:[#allocation5 + $0xb0] ss:$8 sps:$4 sm:$0xff]  }
 0x15b   : > { %976 = vmatpush3.bf16.msra.mxu1 %v1051_v21 }
 0x15c   : > { %534 = vmatprep.subr.bf16.mxu1 %v1054_v40 }
 0x229   : > { %v396_v22 = vpop.f32.mrb[0].mxu1 }
 0x22a   : > { %v903_v23 = vmul.f32 -1.442695, %v396_v22  ;;  %v971_v24 = vpop.f32.mrb[1].mxu1  ;;  %v473_v25 = vsel %vm291_vm1, %v396_v22, 0.0 }
 0x22b   : > { %474 = vadd.xlane.f32.xlu1 %v473_v25  ;;  %v399_v26 = vpop.f32.mrb[2].mxu1 }
 0x22c   : > { %1074 = vpow2.f32 %v903_v23  ;;  %v972_v27 = vpop.f32.mrb[3].mxu1 }
 0x236   : > { %v1075_v28 = vpop.eup %1074 }
 0x237   : > { %v405_v29 = vadd.f32 1.0, %v1075_v28 }
 0x239   : > { %1076 = vrcp.f32 %v405_v29 }
 0x243   : > { %v1077_v30 = vpop.eup %1076 }
 0x244   : > { %v408_v31 = vmul.f32 %v1077_v30, %v396_v22 }
 0x246   : > { %v409_v32 = vpack.c.bf16 %v408_v31, %v408_v31 }
 0x248   : > { %416 = vrot.lane.b32.xlu0 %v409_v32, %s1192_s13 }
 0x2b8   : > { %v475_v33 = vpop.xlane.xlu1 %474 }
 0x2b9   : > { %v477_v34 = vmul.f32 0.03125, %v475_v33 }
 0x2ba   : > { %v417_v35 = vpop.permute.xlu0 %416 }
 0x2bb   : > { %v478_v36 = vsub.f32 %v396_v22, %v477_v34  ;;  %978 = vmatmul.mubr.msk.bf16.vlgmr.msra.gmra.mrb[4].mxu1 %vm291_vm1, %v417_v35 }
 0x2bc   : > { %566 = vmatprep.mubr.bf16.mxu1 %v1186_v0  ;;  %535 = vmatpush1.bf16.msra.mxu1 %v1052_v39  ;;  %v1064_v0 = vld [vmem:[#allocation5 + $0x130] ss:$8 sps:$4 sm:$0xff]  }
 0x2bd   : > { %v479_v37 = vmul.f32 %v478_v36, %v478_v36  ;;  %536 = vmatprep.subr.bf16.mxu1 %v1057_v41  ;;  %945 = vmatprep.subr.bf16.mxu0 %v1064_v0 }
 0x2be   : > { %946 = vmatpush3.bf16.msra.mxu0 %v1065_v1 }
 0x2bf   : > { %v480_v38 = vsel %vm291_vm1, %v479_v37, 0.0  ;;  %947 = vmatprep.subr.bf16.mxu0 %v1066_v3 }
 0x2c0   : > { %481 = vadd.xlane.f32.xlu0 %v480_v38  ;;  %537 = vmatpush1.bf16.msra.mxu1 %v1055_v42  ;;  %v1193_v42 = vmov 4  }
 0x2c1   : > { %1044 = vset.pattern.permute.xlu1 %v1193_v42  ;;  %1045 = vset.pattern.permute.xlu0 %v1193_v42 }
 0x2c2   : > { %948 = vmatpush3.bf16.msra.mxu0 %v1067_v4 }
 0x2c3   : > { %949 = vmatprep.subr.bf16.mxu0 %v1068_v5 }
 0x2c6   : > { %950 = vmatpush3.bf16.msra.mxu0 %v1069_v6 }
 0x2c7   : > { %951 = vmatprep.subr.bf16.mxu0 %v1070_v7 }
 0x2ca   : > { %952 = vmatpush3.bf16.msra.mxu0 %v1071_v8 }
 0x2cb   : > { %953 = vmatprep.subr.bf16.mxu0 %v1072_v9 }
 0x2ce   : > { %954 = vmatpush3.bf16.msra.mxu0 %v1073_v10 }
 0x34d   : > { %v482_v49 = vpop.xlane.xlu0 %481 }
 0x34e   : > { %v483_v50 = vmul.f32 0.03125, %v482_v49 }
 0x350   : > { %v484_v51 = vadd.f32 1e-06, %v483_v50 }
 0x352   : > { %1078 = vrsqrt.f32 %v484_v51 }
 0x35c   : > { %v1079_v52 = vpop.eup %1078 }
 0x35d   : > { %v486_v53 = vmul.f32 %v1079_v52, %v478_v36 }
 0x38e   : > { %v467_v44 = vpop.f32.mrb[4].mxu1 }
 0x38f   : > { %v468_v45 = vadd.f32 %v467_v44, %v414_v43  ;;  %v979_v46 = vpop.f32.mrb[5].mxu1  ;;  %v627_v44 = vld [vmem:[%s1400_s4 + $0x2] ss:$0 sm:$0xff] }
 0x390   : > { %v470_v47 = vpop.f32.mrb[6].mxu1 }
 0x391   : > { %488 = vrot.lane.b32.xlu0 %v468_v45, %s1192_s13  ;;  %v980_v48 = vpop.f32.mrb[7].mxu1 }
 0x403   : > { %v489_v54 = vpop.permute.xlu0 %488 }
 0x404   : > { %v491_v55 = vmul.f32 %v489_v54, %v486_v53 }
 0x406   : > { %v492_v56 = vadd.f32 %v491_v55, %v468_v45 }
 0x408   : > { %v493_v57 = vpack.c.bf16 %v492_v56, %v492_v56 }
 0x40a   : > { %912 = vmatmul.mubr.msk.bf16.vlgmr.msra.gmra.mrb[8].mxu1 %vm291_vm1, %v493_v57 }
 0x4dd   : > { %v568_v17 = vpop.f32.mrb[8].mxu1 }
 0x4de   : > { %v569_v18 = vadd.f32 %v568_v17, %v504_v15  ;;  %v570_v19 = vpop.f32.mrb[9].mxu1 }
 0x4df   : > { %v571_v20 = vadd.f32 %v570_v19, %v508_v16  ;;  %v572_v21 = vpop.f32.mrb[10].mxu1 }
 0x4e0   : > { %v577_v22 = vmul.f32 0.044715, %v569_v18  ;;  %v573_v23 = vpop.f32.mrb[11].mxu1  ;;  %v575_v34 = vmul.f32 0.5, %v569_v18 }
 0x4e1   : > { %v578_v24 = vmul.f32 0.044715, %v571_v20  ;;  %v576_v36 = vmul.f32 0.5, %v571_v20 }
 0x4e2   : > { %v579_v25 = vmul.f32 %v577_v22, %v569_v18 }
 0x4e3   : > { %v580_v26 = vmul.f32 %v578_v24, %v571_v20 }
 0x4e4   : > { %v581_v27 = vmul.f32 %v579_v25, %v569_v18 }
 0x4e5   : > { %v582_v2 = vmul.f32 %v580_v26, %v571_v20 }
 0x4e6   : > { %v583_v28 = vadd.f32 %v581_v27, %v569_v18 }
 0x4e7   : > { %v584_v29 = vadd.f32 %v582_v2, %v571_v20 }
 0x4e8   : > { %v585_v30 = vmul.f32 0.7978846, %v583_v28 }
 0x4e9   : > { %v586_v31 = vmul.f32 0.7978846, %v584_v29 }
 0x4ea   : > { %1080 = vtanh.f32 %v585_v30 }
 0x4eb   : > { %1082 = vtanh.f32 %v586_v31 }
 0x4f4   : > { %v1081_v32 = vpop.eup %1080 }
 0x4f5   : > { %v1083_v33 = vpop.eup %1082  ;;  %v589_v35 = vadd.f32 1.0, %v1081_v32 }
 0x4f6   : > { %v590_v37 = vadd.f32 1.0, %v1083_v33 }
 0x4f7   : > { %v591_v38 = vmul.f32 %v589_v35, %v575_v34 }
 0x4f8   : > { %v592_v39 = vmul.f32 %v590_v37, %v576_v36 }
 0x4f9   : > { %v593_v41 = vpack.c.bf16 %v591_v38, %v591_v38 }
 0x4fa   : > { %v594_v40 = vpack.c.bf16 %v592_v39, %v592_v39 }
 0x4fc   : > { %756 = vmatprep.mubr.bf16.mxu0 %v594_v40 }
 0x4fd   : > { %757 = vmatmul.mubr.bf16.vlgmr.msra.gmra.mrb[0].mxu0 %v593_v41 }
 0x5d0   : > { %v955_v43 = vpop.f32.mrb[0].mxu0 }
 0x5d1   : > { %v956_v45 = vpop.f32.mrb[1].mxu0 }
 0x5d2   : > { %v957_v46 = vadd.f32 %v956_v45, %v955_v43  ;;  %v958_v47 = vpop.f32.mrb[2].mxu0 }
 0x5d3   : > { %v959_v48 = vpop.f32.mrb[3].mxu0 }
 0x5d4   : > { %v759_v49 = vadd.f32 %v957_v46, %v627_v44 }
 0x5d6   : > { %v771_v50 = vsel %vm770_vm9, %v759_v49, 0.0 }
 0x5d7   : > { %772 = vadd.xlane.f32.xlu1 %v771_v50 }
 0x5e8   : > { %766 = vperm.xlu1 %1044, %v759_v49  }
 0x664   : > { %v773_v51 = vpop.xlane.xlu1 %772 }
 0x665   : > { %v774_v52 = vrot.slane %v773_v51, 4 }
 0x667   : > { %v775_v53 = vadd.f32 %v774_v52, %v773_v51 }
 0x668   : > { %v767_v58 = vpop.permute.xlu1 %766 }
 0x669   : > { %v776_v54 = vrot.slane %v775_v53, 2  ;;  %v769_v59 = vadd.f32 %v767_v58, %v759_v49 }
 0x66b   : > { %v777_v55 = vadd.f32 %v776_v54, %v775_v53 }
 0x66d   : > { %v778_v56 = vrot.slane %v777_v55, 1 }
 0x66f   : > { %v779_v57 = vadd.f32 %v778_v56, %v777_v55 }
 0x671   : > { %981 = vpush %v779_v57 }
 0x6a2   : > { %s982_s7 = spop %981 }
 0x6a3   : > { %s781_s8 = smul.f32 0.03125, %s982_s7 }
 0x6a5   : > { %v782_v60 = vstv %s781_s8 }
 0x6a6   : > { %v783_v61 = vsub.f32 %v769_v59, %v782_v60 }
 0x6a8   : > { %784 = vst.msk [vmem:[%s288_s23] sm:$0xff] %vm770_vm9, %v783_v61 }
 0x6a9 PF: > { %s1413_s10 = smov %s1294_s18  ;;  %p16_p8 = scmp.ge.s32.totalorder %s1268_s28, 6  }
 0x6aa   : > { %s1414_s18 = smov %s1172_s19  ;;  %s1415_s19 = smov %s1176_s20 }
 0x6ab   : > { %s1416_s20 = smov %s1413_s10  ;;  %s1417_s21 = smov %s1268_s28 }
 0x6ac   :  { %18 = sbr.rel (!%p16_p8) target bundleno = 4 (0x4), region = 91 }
 0x6b3   :  { %804 = vsyncpa [#allocation4], 1 }
 0x6b4   :  { %806 = vsyncpa [#allocation4 + $0x1], 1 }
 0x6b5   :  { %807 = vsyncpa [#allocation6], 1 }

</bundles_post_ra>
